<compile_context>
chip_gen: v7x
topology: tpu7x:2x2x1
jax: 0.10.0
libtpu: 0.0.40
codegen_flags: <defaults>
</compile_context>

<pallas_src>
import functools

import jax
import jax.numpy as jnp
from jax import lax
from jax.experimental import pallas as pl
from jax.experimental.pallas import tpu as pltpu


def _triplet_loss_kernel(emb_ref, coh_ref, out_ref, *, margin):
    b = coh_ref.shape[0]

    # --- pairwise Euclidean distances via one MXU Gram matmul -------------
    x = emb_ref[...]                                              # [B, D], native dtype
    gram = lax.dot_general(x, x, (((1,), (1,)), ((), ())),
                           preferred_element_type=jnp.float32)    # [B, B] f32

    rows = lax.broadcasted_iota(jnp.int32, (b, b), 0)
    cols = lax.broadcasted_iota(jnp.int32, (b, b), 1)
    eye = (rows == cols).astype(jnp.float32)

    # Squared norms from the Gram diagonal (no transpose needed).
    diag = gram * eye
    sq_a = jnp.sum(diag, axis=1, keepdims=True)                   # [B, 1]  ||x_a||^2
    sq_p = jnp.sum(diag, axis=0, keepdims=True)                   # [1, B]  ||x_p||^2
    d2 = jnp.maximum(sq_a + sq_p - 2.0 * gram, 0.0)
    d2 = d2 * (1.0 - eye)                                         # exact-zero diagonal, as cdist
    dist = jnp.sqrt(d2)                                           # [B, B]

    coh = coh_ref[...]                                            # [B, B] f32 in {0, 1}

    # --- triplet slab [B, B*B], column c = p*B + n, built fully in-kernel --
    # sel_pos[k, c] = (k == c // B), written as a range compare (no int div/mod).
    k = lax.broadcasted_iota(jnp.int32, (b, b * b), 0)
    c = lax.broadcasted_iota(jnp.int32, (b, b * b), 1)
    kb = k * b
    sel_pos = jnp.logical_and(c >= kb, c < kb + b).astype(jnp.float32)

    # p-dependent slabs via tiny exact 0/1 MXU selection matmuls.
    dp = jnp.dot(dist, sel_pos, preferred_element_type=jnp.float32)    # d[a, p]
    cohp = jnp.dot(coh, sel_pos, preferred_element_type=jnp.float32)   # coh[a, p]
    # n-dependent slabs are plain lane tiles (no matmul, no HBM traffic).
    dn = jnp.concatenate([dist] * b, axis=1)                           # d[a, n]
    ncohn = jnp.concatenate([1.0 - coh] * b, axis=1)                   # 1 - coh[a, n]

    valid = cohp * ncohn                                               # {0, 1}
    td = (dp - dn) * valid
    # Margin is added to ALL B^3 entries before clamping (PyTorch quirk):
    # every invalid triplet contributes max(margin, 0).
    terms = jnp.maximum(td + jnp.float32(margin), 0.0)
    total = jnp.sum(terms, keepdims=True)                              # (1, 1)

    # Normalizer without the B^3 tensor: count = sum_a r_a * (B - r_a).
    r = jnp.sum(coh, axis=1, keepdims=True)                            # [B, 1]
    count = jnp.sum(r * (jnp.float32(b) - r), keepdims=True)           # (1, 1)

    # count == 0 yields inf/nan, exactly like the reference module.
    out_ref[...] = total / count


def batch_triplet_margin_loss(entity_types, embeddings, margin=1.0):
    """Pallas TPU equivalent of BatchTripletMarginLoss().forward(entity_types, embeddings)."""
    b, d_model = embeddings.shape

    # O(B^2) coherence matrix; exact integer comparison stays in the wrapper.
    coh = (entity_types.reshape(b, 1) == entity_types.reshape(1, b)).astype(jnp.float32)

    # Advisory cost hint: Gram matmul + 2 selection matmuls + elementwise slab work.
    itemsize = jnp.dtype(embeddings.dtype).itemsize
    flops = 2 * b * b * d_model + 4 * b * b * b * b + 8 * b * b * b
    cost = pl.CostEstimate(
        flops=flops,
        transcendentals=b * b,                               # sqrt per distance entry
        bytes_accessed=itemsize * b * d_model + 4 * (b * b + 1),
    )

    kernel = functools.partial(_triplet_loss_kernel, margin=float(margin))
    loss = pl.pallas_call(
        kernel,
        out_shape=jax.ShapeDtypeStruct((1, 1), jnp.float32),
        in_specs=[
            pl.BlockSpec(memory_space=pltpu.MemorySpace.VMEM),   # embeddings [B, D]
            pl.BlockSpec(memory_space=pltpu.MemorySpace.VMEM),   # coherence  [B, B]
        ],
        out_specs=pl.BlockSpec(memory_space=pltpu.MemorySpace.VMEM),
        cost_estimate=cost,
    )(embeddings, coh)

    return loss[0, 0]


def _reference(entity_types, embeddings, margin=1.0):
    """Pure-JAX reference mirroring the PyTorch module."""
    t = entity_types.astype(jnp.float32)
    coh = (t[:, None] - t[None, :]) == 0
    valid = coh[:, :, None] & (~coh[:, None, :])
    diff = embeddings[:, None, :] - embeddings[None, :, :]
    d = jnp.sqrt(jnp.sum(diff * diff, axis=-1))
    td = (d[:, :, None] - d[:, None, :]) * valid.astype(jnp.float32)
    loss = jnp.maximum(td + margin, 0.0).sum()
    return loss / valid.sum()


if __name__ == "__main__":
    key = jax.random.PRNGKey(0)
    B, D = 8, 768                                  # small batch, hidden=768 as in the module docstring
    # Deterministic, mixed entity types so that valid_triplets.sum() > 0.
    entity_types = jnp.array([0, 1, 0, 2, 1, 0, 2, 1], dtype=jnp.int32)
    embeddings = jax.random.normal(key, (B, D), dtype=jnp.float32)

    loss = batch_triplet_margin_loss(entity_types, embeddings, margin=1.0)
    loss = jax.block_until_ready(loss)

    ref = _reference(entity_types, embeddings, margin=1.0)
    # Slightly looser atol: the kernel uses the Gram-matrix cdist + MXU
    # accumulation order, the reference uses elementwise diffs in f32.
    assert jnp.allclose(loss, ref, rtol=1e-3, atol=2e-2), (loss, ref)

    print("KERNEL_OK")
</pallas_src>

<mosaic_0001>
module attributes {stable_mosaic.version = 11 : i64} {
  func.func @_triplet_loss_kernel(%arg0: memref<8x768xf32, #tpu.memory_space<vmem>>, %arg1: memref<8x8xf32, #tpu.memory_space<vmem>>, %arg2: memref<1x1xf32, #tpu.memory_space<vmem>>) attributes {dimension_semantics = [], scalar_prefetch = 0 : i64, scratch_operands = 0 : i64, tpu.core_type = #tpu.core_type<tc>} {
    %c0 = arith.constant 0 : index
    %c0_0 = arith.constant 0 : index
    %0 = vector.load %arg0[%c0, %c0_0] : memref<8x768xf32, #tpu.memory_space<vmem>>, vector<8x768xf32>
    %cst = arith.constant dense<0.000000e+00> : vector<8x8xf32>
    %1 = tpu.matmul %0, %0, %cst {dimension_numbers = #tpu.dot_dimension_numbers<[1], [1], [0], [0], [0, 0, 1, 0], [], []>} : vector<8x768xf32>, vector<8x768xf32>, vector<8x8xf32> -> vector<8x8xf32>
    %2 = tpu.iota {dimensions = array<i32: 0>} : vector<8x8xi32>
    %3 = tpu.iota {dimensions = array<i32: 1>} : vector<8x8xi32>
    %4 = arith.cmpi eq, %2, %3 : vector<8x8xi32>
    %5 = arith.extui %4 : vector<8x8xi1> to vector<8x8xi32>
    %6 = arith.sitofp %5 : vector<8x8xi32> to vector<8x8xf32>
    %7 = arith.mulf %1, %6 : vector<8x8xf32>
    %cst_1 = arith.constant dense<0.000000e+00> : vector<8xf32>
    %8 = vector.multi_reduction <add>, %7, %cst_1 [1] : vector<8x8xf32> to vector<8xf32>
    %9 = vector.shape_cast %8 : vector<8xf32> to vector<8x1xf32>
    %cst_2 = arith.constant dense<0.000000e+00> : vector<8xf32>
    %10 = vector.multi_reduction <add>, %7, %cst_2 [0] : vector<8x8xf32> to vector<8xf32>
    %11 = vector.shape_cast %10 : vector<8xf32> to vector<1x8xf32>
    %12 = vector.broadcast %9 : vector<8x1xf32> to vector<8x8xf32>
    %13 = vector.broadcast %11 : vector<1x8xf32> to vector<8x8xf32>
    %14 = arith.addf %12, %13 : vector<8x8xf32>
    %cst_3 = arith.constant 2.000000e+00 : f32
    %15 = vector.broadcast %cst_3 : f32 to vector<8x8xf32>
    %16 = arith.mulf %15, %1 : vector<8x8xf32>
    %17 = arith.subf %14, %16 : vector<8x8xf32>
    %cst_4 = arith.constant 0.000000e+00 : f32
    %18 = vector.broadcast %cst_4 : f32 to vector<8x8xf32>
    %19 = arith.maximumf %17, %18 : vector<8x8xf32>
    %cst_5 = arith.constant 1.000000e+00 : f32
    %20 = vector.broadcast %cst_5 : f32 to vector<8x8xf32>
    %21 = arith.subf %20, %6 : vector<8x8xf32>
    %22 = arith.mulf %19, %21 : vector<8x8xf32>
    %23 = math.sqrt %22 : vector<8x8xf32>
    %c0_6 = arith.constant 0 : index
    %c0_7 = arith.constant 0 : index
    %24 = vector.load %arg1[%c0_6, %c0_7] : memref<8x8xf32, #tpu.memory_space<vmem>>, vector<8x8xf32>
    %25 = tpu.iota {dimensions = array<i32: 0>} : vector<8x64xi32>
    %26 = tpu.iota {dimensions = array<i32: 1>} : vector<8x64xi32>
    %c8_i32 = arith.constant 8 : i32
    %27 = vector.broadcast %c8_i32 : i32 to vector<8x64xi32>
    %28 = arith.muli %25, %27 : vector<8x64xi32>
    %29 = arith.cmpi sge, %26, %28 : vector<8x64xi32>
    %c8_i32_8 = arith.constant 8 : i32
    %30 = vector.broadcast %c8_i32_8 : i32 to vector<8x64xi32>
    %31 = arith.addi %28, %30 : vector<8x64xi32>
    %32 = arith.cmpi slt, %26, %31 : vector<8x64xi32>
    %33 = arith.andi %29, %32 : vector<8x64xi1>
    %34 = arith.extui %33 : vector<8x64xi1> to vector<8x64xi32>
    %35 = arith.sitofp %34 : vector<8x64xi32> to vector<8x64xf32>
    %cst_9 = arith.constant dense<0.000000e+00> : vector<8x64xf32>
    %36 = tpu.matmul %23, %35, %cst_9 {dimension_numbers = #tpu.dot_dimension_numbers<[1], [0], [0], [1], [0, 0, 1, 1], [], []>} : vector<8x8xf32>, vector<8x64xf32>, vector<8x64xf32> -> vector<8x64xf32>
    %cst_10 = arith.constant dense<0.000000e+00> : vector<8x64xf32>
    %37 = tpu.matmul %24, %35, %cst_10 {dimension_numbers = #tpu.dot_dimension_numbers<[1], [0], [0], [1], [0, 0, 1, 1], [], []>} : vector<8x8xf32>, vector<8x64xf32>, vector<8x64xf32> -> vector<8x64xf32>
    %38 = tpu.concatenate %23, %23, %23, %23, %23, %23, %23, %23 in 1 : vector<8x8xf32>, vector<8x8xf32>, vector<8x8xf32>, vector<8x8xf32>, vector<8x8xf32>, vector<8x8xf32>, vector<8x8xf32>, vector<8x8xf32> -> vector<8x64xf32>
    %cst_11 = arith.constant 1.000000e+00 : f32
    %39 = vector.broadcast %cst_11 : f32 to vector<8x8xf32>
    %40 = arith.subf %39, %24 : vector<8x8xf32>
    %41 = tpu.concatenate %40, %40, %40, %40, %40, %40, %40, %40 in 1 : vector<8x8xf32>, vector<8x8xf32>, vector<8x8xf32>, vector<8x8xf32>, vector<8x8xf32>, vector<8x8xf32>, vector<8x8xf32>, vector<8x8xf32> -> vector<8x64xf32>
    %42 = arith.mulf %37, %41 : vector<8x64xf32>
    %43 = arith.subf %36, %38 : vector<8x64xf32>
    %44 = arith.mulf %43, %42 : vector<8x64xf32>
    %cst_12 = arith.constant 1.000000e+00 : f32
    %45 = vector.broadcast %cst_12 : f32 to vector<8x64xf32>
    %46 = arith.addf %44, %45 : vector<8x64xf32>
    %cst_13 = arith.constant 0.000000e+00 : f32
    %47 = vector.broadcast %cst_13 : f32 to vector<8x64xf32>
    %48 = arith.maximumf %46, %47 : vector<8x64xf32>
    %49 = vector.shape_cast %48 : vector<8x64xf32> to vector<1x8x64xf32>
    %cst_14 = arith.constant dense<0.000000e+00> : vector<1xf32>
    %50 = vector.multi_reduction <add>, %49, %cst_14 [1, 2] : vector<1x8x64xf32> to vector<1xf32>
    %51 = vector.shape_cast %50 : vector<1xf32> to vector<1x1x1xf32>
    %52 = vector.extract %51[0, 0, 0] : f32 from vector<1x1x1xf32>
    %53 = vector.broadcast %52 : f32 to vector<1x1xf32>
    %cst_15 = arith.constant dense<0.000000e+00> : vector<8xf32>
    %54 = vector.multi_reduction <add>, %24, %cst_15 [1] : vector<8x8xf32> to vector<8xf32>
    %55 = vector.shape_cast %54 : vector<8xf32> to vector<8x1xf32>
    %cst_16 = arith.constant 8.000000e+00 : f32
    %56 = vector.broadcast %cst_16 : f32 to vector<8x1xf32>
    %57 = arith.subf %56, %55 : vector<8x1xf32>
    %58 = arith.mulf %55, %57 : vector<8x1xf32>
    %59 = vector.shape_cast %58 : vector<8x1xf32> to vector<1x8x1xf32>
    %cst_17 = arith.constant dense<0.000000e+00> : vector<1xf32>
    %60 = vector.multi_reduction <add>, %59, %cst_17 [1, 2] : vector<1x8x1xf32> to vector<1xf32>
    %61 = vector.shape_cast %60 : vector<1xf32> to vector<1x1x1xf32>
    %62 = vector.extract %61[0, 0, 0] : f32 from vector<1x1x1xf32>
    %63 = vector.broadcast %62 : f32 to vector<1x1xf32>
    %64 = arith.divf %53, %63 : vector<1x1xf32>
    %c0_18 = arith.constant 0 : index
    %c0_19 = arith.constant 0 : index
    %65 = vector.load %arg2[%c0_18, %c0_19] : memref<1x1xf32, #tpu.memory_space<vmem>>, vector<1x1xf32>
    tpu.vector_store %arg2[%c0_18, %c0_19], %64 {strides = array<i32>} : memref<1x1xf32, #tpu.memory_space<vmem>>, vector<1x1xf32>,
    return
  }
}

</mosaic_0001>

<bundles_post_ra>
// kernel: tpu_custom_call.1
= control target key start
LH: loop header
LB: loop body
LE: loop exit
PB: predicated region body
PF: predicated region fallthrough
CT: control target
= control target key end

     0   :  { %7 = vsyncpa [#allocation3], 0  ;;  %s772_s0 = inlined_call_operand.hbm [shape: f32[8,768], index: 0, kind: input, shape index: {}]   ;;  %s773_s1 = inlined_call_operand.hbm [shape: f32[8,8], index: 1, kind: input, shape index: {}]   ;;  %s774_s2 = inlined_call_operand.hbm [shape: f32[1,1], index: 2, kind: output, shape index: {}]  }
   0x1   :  { %8 = vsyncpa [#allocation6], 0 }
   0x2   :  { %9 = vsyncpa [#allocation4], 0  ;;  %s672_s9 = smov [#allocation2]   ;;  %s673_s11 = smov [#allocation5]  }
   0x3   :  { %s16_s10 = sshll.u32 %s672_s9, 4  ;;  %s26_s12 = sshll.u32 %s673_s11, 4  ;;  %s17_s10 = int_to_ptr.vmem [resolvable:$true] %s16_s10  ;;  %s27_s12 = int_to_ptr.vmem [resolvable:$true] %s26_s12 }
   0x4   :  { %s600_s15 = scalar_lea.hbm %s772_s0, 768 }
   0x5   :  { %p601_p0 = scmp.ne.s32.totalorder %s772_s0, %s600_s15  ;;  %p604_p1 = scmp.lt.u32.totalorder %s600_s15, %s772_s0 }
   0x7   :  { %p606_p2 = pnand %p604_p1, %p601_p0 }
   0x9   :  { %609 = shalt.err (!%p606_p2)
}
   0xa   :  { %s610_s20 = scalar_lea.vmem %s17_s10, 768  ;;  %p615_p4 = scmp.lt.s32.totalorder %s17_s10, %s17_s10 }
   0xb   :  { %p611_p3 = scmp.ne.s32.totalorder %s17_s10, %s610_s20  ;;  %p616_p5 = scmp.lt.s32.totalorder %s610_s20, %s610_s20 }
   0xd   :  { %p617_p6 = por %p616_p5, %p615_p4 }
   0xf   :  { %p618_p7 = pnand %p617_p6, %p611_p3 }
  0x11   :  { %621 = shalt.err (!%p618_p7)
}
  0x12   :  { %19 = dma.hbm_to_vmem [thread:$0]  %s772_s0, 768, %s17_s10, [#allocation3]  }
  0x13   :  { %s622_s25 = scalar_lea.hbm %s773_s1, 128 }
  0x14   :  { %p623_p8 = scmp.ne.s32.totalorder %s773_s1, %s622_s25  ;;  %p626_p9 = scmp.lt.u32.totalorder %s622_s25, %s773_s1 }
  0x16   :  { %p628_p10 = pnand %p626_p9, %p623_p8 }
  0x18   :  { %631 = shalt.err (!%p628_p10)
}
  0x19   :  { %s632_s30 = scalar_lea.vmem %s27_s12, 128  ;;  %p637_p12 = scmp.lt.s32.totalorder %s27_s12, %s27_s12 }
  0x1a   :  { %p633_p11 = scmp.ne.s32.totalorder %s27_s12, %s632_s30  ;;  %p638_p13 = scmp.lt.s32.totalorder %s632_s30, %s632_s30 }
  0x1c   :  { %p639_p0 = por %p638_p13, %p637_p12 }
  0x1e   :  { %p640_p1 = pnand %p639_p0, %p633_p11 }
  0x20   :  { %643 = shalt.err (!%p640_p1)
}
  0x21   :  { %29 = dma.hbm_to_vmem [thread:$0]  %s773_s1, 128, %s27_s12, [#allocation6]  }
  0x22   :  { %666 = dma.done.wait [#allocation3], 768  }
  0x23   :  { %667 = vsyncadd [#allocation3], 4294966528 }
  0x24   :  { %668 = dma.done.wait [#allocation6], 128  }
  0x25   :  { %669 = vsyncadd [#allocation6], 4294967168  ;;  %v37_v0 = vld [vmem:[#allocation2 + $0x8] sm:$0xff]  ;;  %v36_v1 = vld [vmem:[#allocation2] sm:$0xff]  ;;  %v674_v6 = vmov 0.0   ;;  %v252_v7 = vlaneseq  ;;  %vm260_vm1 = vcmask 64512  }
  0x26   :  { %v39_v2 = vld [vmem:[#allocation2 + $0x18] sm:$0xff]  ;;  %42 = vmatprep.subr.mxu0 %v37_v0  ;;  %106 = vmatprep.mubr.f32.mxu0 %v37_v0  ;;  %v38_v3 = vld [vmem:[#allocation2 + $0x10] sm:$0xff]  ;;  %v41_v4 = vld [vmem:[#allocation2 + $0x28] sm:$0xff]  ;;  %s675_s1 = smov 8   ;;  %s676_s4 = smov 16   ;;  %vm680_vm4 = vmmov 0  }
  0x27   :  { %43 = vmatpush1.xpose.msra.mxu0 %v36_v1  ;;  %v40_v5 = vld [vmem:[#allocation2 + $0x20] sm:$0xff]  ;;  %565 = vmatprep.subr.mxu1 %v674_v6  ;;  %v253_v8 = vshrl.u32 %v252_v7, 7  ;;  %v255_v9 = vand.u32 127, %v252_v7  ;;  %v283_v14 = vld [vmem:[#allocation5] sm:$0xff]  ;;  %s677_s5 = smov 24   ;;  %s678_s6 = smov 32  }
  0x28   :  { %112 = vmatprep.subr.mxu0 %v39_v2  ;;  %v518_v16 = vsel %vm260_vm1, %v283_v14, 0.0  ;;  %v726_v17 = vsub.f32 1.0, %v283_v14  ;;  %s679_s7 = smov 40   ;;  %567 = vmatprep.mubr.msk.f32.mxu1 %vm680_vm4, %v674_v6  ;;  %v681_v21 = vmov 1.0   ;;  %s682_s8 = smov 48   ;;  %vm523_vm8 = vcmask 7168  }
  0x29   :  { %vm256_vm0 = vcmp.eq.s32.totalorder %v253_v8, %v255_v9  ;;  %v284_v18 = vmul.u32 8, %v253_v8  ;;  %s683_s9 = smov 56   ;;  %vm459_vm9 = vcmask 130048   ;;  %vm461_vm10 = vcmask 195584   ;;  %s684_s12 = smov [#allocation7]  }
  0x2a   :  { %107 = vmatmul.mubr.f32.vlgmr.msra.gmra.mrb[0].mxu0 %v36_v1  ;;  %v555_v10 = vsel %vm256_vm0, 1.0, %v674_v6  ;;  %473 = vrot.lane.b32.xlu1 %v726_v17, %s675_s1  ;;  %vm463_vm11 = vcmask 261120   ;;  %vm465_vm12 = vcmask 326656   ;;  %vm467_vm13 = vcmask 392192   ;;  %s545_s13 = sshll.u32 %s684_s12, 4  ;;  %s546_s13 = int_to_ptr.vmem [resolvable:$true] %s545_s13 }
  0x2b   :  { %113 = vmatpush1.xpose.msra.mxu0 %v38_v3  ;;  %176 = vmatprep.mubr.f32.mxu0 %v39_v2  ;;  %v286_v19 = vadd.s32 8, %v284_v18  ;;  %vm285_vm2 = vcmp.ge.s32.totalorder %v255_v9, %v284_v18  ;;  %v274_v31 = vsub.f32 1.0, %v555_v10  ;;  %vm469_vm14 = vcmask 457728   ;;  %s644_s14 = scalar_lea.vmem %s546_s13, 16  ;;  %s648_s15 = scalar_lea.vmem %s546_s13, 32 }
  0x2c   :  { %182 = vmatprep.subr.mxu0 %v41_v4  ;;  %vm506_vm15 = vcmask 523264   ;;  %vm537_vm0 = vcmask 0   ;;  %p645_p2 = scmp.ne.s32.totalorder %s546_s13, %s644_s14  ;;  %p649_p3 = scmp.lt.s32.totalorder %s546_s13, %s546_s13 }
  0x2d   :  { %vm287_vm3 = vcmp.lt.s32.totalorder %v255_v9, %v286_v19  ;;  %p650_p4 = scmp.lt.s32.totalorder %s648_s15, %s644_s14 }
  0x2e   :  { %476 = vrot.lane.b32.xlu1 %v726_v17, %s676_s4  ;;  %vm739_vm5 = vmand %vm285_vm2, %vm287_vm3 }
  0x2f   :  { %566 = vmatpush3.msk.msra.mxu1 %vm739_vm5, %v681_v21  ;;  %p651_p5 = por %p650_p4, %p649_p3 }
  0x30   :  { %570 = vmatprep.subr.mxu1 %v674_v6 }
  0x31   :  { %p652_p6 = pnand %p651_p5, %p645_p2 }
  0x32   :  { %177 = vmatmul.mubr.f32.vlgmr.msra.gmra.mrb[0].mxu0 %v38_v3  ;;  %479 = vrot.lane.b32.xlu1 %v726_v17, %s677_s5 }
  0x33   :  { %183 = vmatpush1.xpose.msra.mxu0 %v40_v5  ;;  %246 = vmatprep.mubr.f32.mxu0 %v41_v4 }
  0x36   :  { %482 = vrot.lane.b32.xlu1 %v726_v17, %s678_s6 }
  0x3a   :  { %247 = vmatmul.mubr.f32.vlgmr.msra.gmra.mrb[0].mxu0 %v40_v5 }
  0x9c   :  { %v474_v44 = vpop.permute.xlu1 %473 }
  0x9d   :  { %v494_v52 = vsel %vm260_vm1, %v726_v17, %v474_v44 }
  0xa0   :  { %v477_v45 = vpop.permute.xlu1 %476 }
  0xa1   :  { %v495_v53 = vsel %vm459_vm9, %v494_v52, %v477_v45 }
  0xa4   :  { %v480_v46 = vpop.permute.xlu1 %479 }
  0xa5   :  { %v496_v56 = vsel %vm461_vm10, %v495_v53, %v480_v46 }
  0xa8   :  { %v483_v47 = vpop.permute.xlu1 %482 }
  0xa9   :  { %v497_v58 = vsel %vm463_vm11, %v496_v56, %v483_v47 }
 0x10d   :  { %v248_v11 = vpop.f32.mrb[0].mxu0 }
 0x10e   :  { %v259_v12 = vmul.f32 %v555_v10, %v248_v11  ;;  %v250_v13 = vpop.f32.mrb[1].mxu0  ;;  %v271_v29 = vmul.f32 2.0, %v248_v11 }
 0x110   :  { %v261_v15 = vsel %vm260_vm1, %v259_v12, 0.0 }
 0x111   :  { %262 = vadd.xlane.f32.xlu0 %v261_v15  ;;  %v264_v22 = vrot.slane %v261_v15, 4 }
 0x113   :  { %v265_v23 = vadd.f32 %v264_v22, %v261_v15 }
 0x115   :  { %519 = vadd.xlane.f32.xlu0 %v518_v16  ;;  %v266_v24 = vrot.slane %v265_v23, 2 }
 0x117   :  { %v267_v25 = vadd.f32 %v266_v24, %v265_v23 }
 0x119   :  { %v268_v26 = vrot.slane %v267_v25, 1 }
 0x11b   :  { %v269_v27 = vadd.f32 %v268_v26, %v267_v25 }
 0x12b   :  { %485 = vrot.lane.b32.xlu0 %v726_v17, %s679_s7 }
 0x19e   :  { %v263_v28 = vpop.xlane.xlu0 %262 }
 0x19f   :  { %v270_v30 = vadd.f32 %v269_v27, %v263_v28 }
 0x1a1   :  { %v272_v32 = vsub.f32 %v270_v30, %v271_v29 }
 0x1a2   :  { %v520_v40 = vpop.xlane.xlu0 %519 }
 0x1a3   :  { %v273_v33 = vmax.f32 %v272_v32, 0.0  ;;  %v521_v41 = vsub.f32 8.0, %v520_v40 }
 0x1a5   :  { %v275_v34 = vmul.f32 %v274_v31, %v273_v33  ;;  %v522_v42 = vmul.f32 %v521_v41, %v520_v40 }
 0x1a6   :  { %v486_v51 = vpop.permute.xlu0 %485 }
 0x1a7   :  { %596 = vrsqrt.f32 %v275_v34  ;;  %vm278_vm6 = vcmp.eq.f32.partialorder %v275_v34, inf  ;;  %v281_v37 = vand.u32 2147483648, %v275_v34  ;;  %vm280_vm7 = vcmp.eq.f32.partialorder %v275_v34, 0.0 }
 0x1a8   :  { %v524_v43 = vsel %vm523_vm8, %v522_v42, 0.0  ;;  %v498_v61 = vsel %vm465_vm12, %v497_v58, %v486_v51 }
 0x1b1   :  { %v597_v35 = vpop.eup %596 }
 0x1b2   :  { %v277_v36 = vmul.f32 %v597_v35, %v275_v34 }
 0x1b4   :  { %v279_v38 = vsel %vm278_vm6, %v275_v34, %v277_v36 }
 0x1b5   :  { %v282_v39 = vsel %vm280_vm7, %v281_v37, %v279_v38 }
 0x1b6   :  { %440 = vrot.lane.b32.xlu0 %v282_v39, %s676_s4  ;;  %437 = vrot.lane.b32.xlu1 %v282_v39, %s675_s1 }
 0x1b7   :  { %568 = vmatmul.mubr.msk.f32.vlgmr.msra.gmra.mrb[0].mxu1 %vm260_vm1, %v282_v39 }
 0x1b8   :  { %571 = vmatpush3.msk.msra.mxu1 %vm739_vm5, %v681_v21  ;;  %572 = vmatprep.mubr.msk.f32.mxu1 %vm680_vm4, %v674_v6 }
 0x1ba   :  { %443 = vrot.lane.b32.xlu1 %v282_v39, %s677_s5  ;;  %488 = vrot.lane.b32.xlu0 %v726_v17, %s682_s8 }
 0x1bb   :  { %573 = vmatmul.mubr.msk.f32.vlgmr.msra.gmra.mrb[2].mxu1 %vm260_vm1, %v283_v14 }
 0x1be   :  { %446 = vrot.lane.b32.xlu1 %v282_v39, %s678_s6  ;;  %491 = vrot.lane.b32.xlu0 %v726_v17, %s683_s9 }
 0x1c2   :  { %449 = vrot.lane.b32.xlu1 %v282_v39, %s679_s7 }
 0x1c6   :  { %452 = vrot.lane.b32.xlu1 %v282_v39, %s682_s8 }
 0x1ca   :  { %455 = vrot.lane.b32.xlu1 %v282_v39, %s683_s9 }
 0x1dd   :  { %525 = vadd.xlane.f32.xlu0 %v524_v43 }
 0x228   :  { %v438_v48 = vpop.permute.xlu1 %437  ;;  %v441_v55 = vpop.permute.xlu0 %440 }
 0x229   :  { %v458_v60 = vsel %vm260_vm1, %v282_v39, %v438_v48 }
 0x22a   :  { %v460_v62 = vsel %vm459_vm9, %v458_v60, %v441_v55 }
 0x22c   :  { %v444_v49 = vpop.permute.xlu1 %443  ;;  %v489_v57 = vpop.permute.xlu0 %488 }
 0x22d   :  { %v462_v63 = vsel %vm461_vm10, %v460_v62, %v444_v49  ;;  %v499_v4 = vsel %vm467_vm13, %v498_v61, %v489_v57 }
 0x230   :  { %v447_v50 = vpop.permute.xlu1 %446  ;;  %v492_v0 = vpop.permute.xlu0 %491 }
 0x231   :  { %v464_v2 = vsel %vm463_vm11, %v462_v63, %v447_v50  ;;  %v500_v10 = vsel %vm469_vm14, %v499_v4, %v492_v0 }
 0x234   :  { %v450_v54 = vpop.permute.xlu1 %449 }
 0x235   :  { %v466_v6 = vsel %vm465_vm12, %v464_v2, %v450_v54 }
 0x238   :  { %v453_v59 = vpop.permute.xlu1 %452 }
 0x239   :  { %v468_v7 = vsel %vm467_vm13, %v466_v6, %v453_v59 }
 0x23c   :  { %v456_v3 = vpop.permute.xlu1 %455 }
 0x23d   :  { %v470_v8 = vsel %vm469_vm14, %v468_v7, %v456_v3 }
 0x26a   :  { %v526_v18 = vpop.xlane.xlu0 %525 }
 0x26b   :  { %v527_v19 = vrot.slane %v526_v18, 4 }
 0x26d   :  { %v528_v20 = vadd.f32 %v527_v19, %v526_v18 }
 0x26f   :  { %v529_v21 = vrot.slane %v528_v20, 2 }
 0x271   :  { %v530_v25 = vadd.f32 %v529_v21, %v528_v20 }
 0x273   :  { %v531_v28 = vrot.slane %v530_v25, 1 }
 0x275   :  { %v532_v31 = vadd.f32 %v531_v28, %v530_v25 }
 0x28a   :  { %v360_v1 = vpop.f32.mrb[0].mxu1 }
 0x28b   :  { %v569_v5 = vpop.f32.mrb[1].mxu1  ;;  %v502_v11 = vsub.f32 %v360_v1, %v470_v8 }
 0x28e   :  { %v433_v9 = vpop.f32.mrb[2].mxu1 }
 0x28f   :  { %v501_v12 = vmul.f32 %v500_v10, %v433_v9  ;;  %v574_v13 = vpop.f32.mrb[3].mxu1 }
 0x291   :  { %v503_v14 = vmul.f32 %v502_v11, %v501_v12 }
 0x293   :  { %v504_v15 = vadd.f32 1.0, %v503_v14 }
 0x295   :  { %v505_v16 = vmax.f32 %v504_v15, 0.0 }
 0x297   :  { %v507_v17 = vsel %vm506_vm15, %v505_v16, 0.0 }
 0x298   :  { %508 = vadd.xlane.f32.xlu1 %v507_v17 }
 0x325   :  { %v509_v22 = vpop.xlane.xlu1 %508 }
 0x326   :  { %v510_v23 = vrot.slane %v509_v22, 4 }
 0x328   :  { %v511_v24 = vadd.f32 %v510_v23, %v509_v22 }
 0x32a   :  { %v512_v26 = vrot.slane %v511_v24, 2 }
 0x32c   :  { %v513_v27 = vadd.f32 %v512_v26, %v511_v24 }
 0x32e   :  { %v514_v29 = vrot.slane %v513_v27, 1 }
 0x330   :  { %v515_v30 = vadd.f32 %v514_v29, %v513_v27 }
 0x332   :  { %579 = vpush %v515_v30 }
 0x333   :  { %581 = vpush %v532_v31 }
 0x363   :  { %s580_s10 = spop %579 }
 0x364   :  { %s582_s11 = spop %581  ;;  %v517_v34 = vstv %s580_s10 }
 0x365   :  { %v534_v32 = vstv %s582_s11 }
 0x366   :  { %598 = vrcp.f32 %v534_v32 }
 0x370   :  { %v599_v33 = vpop.eup %598 }
 0x371   :  { %v536_v35 = vmul.f32 %v599_v33, %v517_v34 }
 0x373   :  { %538 = vst.msk [vmem:[#allocation7] sm:$0x1] %vm537_vm0, %v536_v35 }
 0x374   :  { %655 = shalt.err (!%p652_p6)
}
 0x375   :  { %s656_s18 = scalar_lea.hbm %s774_s2, 16 }
 0x376   :  { %p657_p7 = scmp.ne.s32.totalorder %s774_s2, %s656_s18  ;;  %p660_p8 = scmp.lt.u32.totalorder %s656_s18, %s774_s2 }
 0x378   :  { %p662_p9 = pnand %p660_p8, %p657_p7 }
 0x37a   :  { %665 = shalt.err (!%p662_p9)
}
 0x37b   :  { %548 = dma.vmem_to_hbm [thread:$0]  %s546_s13, 16, %s774_s2, [#allocation4]  }
 0x37c   :  { %670 = dma.done.wait [#allocation4], 16  }
 0x37d   :  { %671 = vsyncadd [#allocation4], 4294967280 }
 0x37e   :  { %552 = vsyncpa [#allocation3], 1 }
 0x37f   :  { %553 = vsyncpa [#allocation6], 1 }
 0x380   :  { %554 = vsyncpa [#allocation4], 1 }

</bundles_post_ra>
